<compile_context>
chip_gen: v7x
topology: tpu7x:2x2x1
jax: 0.10.0
libtpu: 0.0.40
codegen_flags: <defaults>
</compile_context>

<pallas_src>
import math
import functools

import jax
import jax.numpy as jnp
from jax import lax
from jax.experimental import pallas as pl
from jax.experimental.pallas import tpu as pltpu


def _self_attention_kernel(x_ref, wq_ref, wk_ref, wv_ref,
                           bq_ref, bk_ref, bv_ref, o_ref, *, bb, seq):
    # x_ref: (BB*SEQ, IN_F); weights: (IN_F, EMB); biases: (1, EMB); o_ref: (BB*SEQ, EMB)
    f32 = jnp.float32
    bf16 = jnp.bfloat16

    x = x_ref[...].astype(bf16)                       # (BB*SEQ, IN_F)
    wq = wq_ref[...].astype(bf16)                     # (IN_F, EMB)
    wk = wk_ref[...].astype(bf16)
    wv = wv_ref[...].astype(bf16)

    def proj(w, b_ref):
        # bf16 operands, f32 accumulation on the MXU.
        y = lax.dot_general(x, w, (((1,), (0,)), ((), ())),
                            preferred_element_type=f32)
        return y + b_ref[...]                         # (BB*SEQ, EMB)

    emb = o_ref.shape[-1]
    inv_sqrt_d = 1.0 / math.sqrt(emb)

    # Fold the 1/sqrt(EMB) scale into q (cheaper than scaling the SEQxSEQ scores).
    q = (proj(wq, bq_ref) * inv_sqrt_d).astype(bf16)
    k = proj(wk, bk_ref).astype(bf16)
    v = proj(wv, bv_ref).astype(bf16)

    # Attention per batch element inside this block (static loop, static aligned slices).
    for bi in range(bb):
        r0 = bi * seq
        qb = q[r0:r0 + seq]                           # (SEQ, EMB)
        kb = k[r0:r0 + seq]
        vb = v[r0:r0 + seq]

        # scores = q @ k^T via last-axis contraction on both operands (no k transpose).
        scores = lax.dot_general(qb, kb, (((1,), (1,)), ((), ())),
                                 preferred_element_type=f32)   # (SEQ, SEQ)

        # Numerically stable softmax along the last axis.
        m = jnp.max(scores, axis=-1, keepdims=True)
        e = jnp.exp(scores - m)
        s = jnp.sum(e, axis=-1, keepdims=True)
        att = (e * pl.reciprocal(s, approx=True)).astype(bf16)

        outb = lax.dot_general(att, vb, (((1,), (0,)), ((), ())),
                               preferred_element_type=f32)     # (SEQ, EMB)
        o_ref[r0:r0 + seq, :] = outb.astype(o_ref.dtype)


@jax.jit
def self_attention(x, wq, wk, wv, bq, bk, bv):
    """x: (B, SEQ, IN_F); wq/wk/wv: (IN_F, EMB) (pre-transposed); bq/bk/bv: (1, EMB)."""
    B, SEQ, IN_F = x.shape
    EMB = wq.shape[1]

    # Fuse as many batch elements per grid step as possible while the fused row axis
    # stays <= 256 (one MXU pass on v6e/v7x) and B % BB == 0.
    bb = 1
    for d in range(1, B + 1):
        if B % d == 0 and d * SEQ <= 256:
            bb = d
    rows = bb * SEQ

    x2d = x.reshape(B * SEQ, IN_F)   # free reshape outside the kernel

    grid_spec = pltpu.PrefetchScalarGridSpec(
        num_scalar_prefetch=0,
        grid=(B // bb,),
        in_specs=[
            pl.BlockSpec((rows, IN_F), lambda b: (b, 0)),    # fused-row x block
            # Constant index_maps: Pallas keeps these blocks resident (no per-step DMA).
            pl.BlockSpec((IN_F, EMB), lambda b: (0, 0)),     # Wq
            pl.BlockSpec((IN_F, EMB), lambda b: (0, 0)),     # Wk
            pl.BlockSpec((IN_F, EMB), lambda b: (0, 0)),     # Wv
            pl.BlockSpec((1, EMB), lambda b: (0, 0)),        # bq
            pl.BlockSpec((1, EMB), lambda b: (0, 0)),        # bk
            pl.BlockSpec((1, EMB), lambda b: (0, 0)),        # bv
        ],
        out_specs=pl.BlockSpec((rows, EMB), lambda b: (b, 0)),
    )

    out2d = pl.pallas_call(
        functools.partial(_self_attention_kernel, bb=bb, seq=SEQ),
        out_shape=jax.ShapeDtypeStruct((B * SEQ, EMB), x.dtype),
        grid_spec=grid_spec,
        compiler_params=pltpu.CompilerParams(
            dimension_semantics=("parallel",)),
    )(x2d, wq, wk, wv, bq, bk, bv)

    return out2d.reshape(B, SEQ, EMB)


def _reference(x, wq, wk, wv, bq, bk, bv):
    q = x @ wq + bq
    k = x @ wk + bk
    v = x @ wv + bv
    dot = jnp.einsum("bqd,bkd->bqk", q, k) / math.sqrt(k.shape[-1])
    att = jax.nn.softmax(dot, axis=-1)
    return jnp.einsum("bqk,bkd->bqd", att, v)


if __name__ == "__main__":
    B, SEQ, IN_F, EMB = 2, 8, 32, 32

    key = jax.random.PRNGKey(0)
    kx, kq, kk, kv, kbq, kbk, kbv = jax.random.split(key, 7)

    # Deterministic init (matches nn.Linear default uniform(-1/sqrt(in), 1/sqrt(in))).
    bound = 1.0 / math.sqrt(IN_F)
    x = jax.random.normal(kx, (B, SEQ, IN_F), dtype=jnp.float32)
    wq = jax.random.uniform(kq, (IN_F, EMB), jnp.float32, -bound, bound)
    wk = jax.random.uniform(kk, (IN_F, EMB), jnp.float32, -bound, bound)
    wv = jax.random.uniform(kv, (IN_F, EMB), jnp.float32, -bound, bound)
    bq = jax.random.uniform(kbq, (1, EMB), jnp.float32, -bound, bound)
    bk = jax.random.uniform(kbk, (1, EMB), jnp.float32, -bound, bound)
    bv = jax.random.uniform(kbv, (1, EMB), jnp.float32, -bound, bound)

    out = self_attention(x, wq, wk, wv, bq, bk, bv)
    out = jax.block_until_ready(out)

    ref = _reference(x, wq, wk, wv, bq, bk, bv)
    assert out.shape == (B, SEQ, EMB)
    # bf16 MXU operands with f32 accumulation + approx reciprocal -> loosened tolerance
    # vs. the pure-f32 reference (per review guidance).
    assert jnp.allclose(out, ref, atol=2e-2, rtol=2e-2), "mismatch vs reference"

    print("KERNEL_OK")
</pallas_src>

<mosaic_0001>
module attributes {stable_mosaic.version = 11 : i64} {
  func.func @_self_attention_kernel(%arg0: i32, %arg1: memref<16x32xf32, #tpu.memory_space<vmem>>, %arg2: memref<32x32xf32, #tpu.memory_space<vmem>>, %arg3: memref<32x32xf32, #tpu.memory_space<vmem>>, %arg4: memref<32x32xf32, #tpu.memory_space<vmem>>, %arg5: memref<1x32xf32, #tpu.memory_space<vmem>>, %arg6: memref<1x32xf32, #tpu.memory_space<vmem>>, %arg7: memref<1x32xf32, #tpu.memory_space<vmem>>, %arg8: memref<16x32xf32, #tpu.memory_space<vmem>>) attributes {dimension_semantics = [#tpu.dimension_semantics<parallel>], iteration_bounds = array<i64: 1>, scalar_prefetch = 0 : i64, scratch_operands = 0 : i64, tpu.core_type = #tpu.core_type<tc>, window_params = [{transform_indices = @transform_0, window_bounds = array<i64: 16, 32>}, {pipeline_mode = #tpu.pipeline_mode<synchronous>, transform_indices = @transform_1, window_bounds = array<i64: 32, 32>}, {pipeline_mode = #tpu.pipeline_mode<synchronous>, transform_indices = @transform_2, window_bounds = array<i64: 32, 32>}, {pipeline_mode = #tpu.pipeline_mode<synchronous>, transform_indices = @transform_3, window_bounds = array<i64: 32, 32>}, {pipeline_mode = #tpu.pipeline_mode<synchronous>, transform_indices = @transform_4, window_bounds = array<i64: 1, 32>}, {pipeline_mode = #tpu.pipeline_mode<synchronous>, transform_indices = @transform_5, window_bounds = array<i64: 1, 32>}, {pipeline_mode = #tpu.pipeline_mode<synchronous>, transform_indices = @transform_6, window_bounds = array<i64: 1, 32>}, {transform_indices = @transform_7, window_bounds = array<i64: 16, 32>}]} {
    %c0 = arith.constant 0 : index
    %c0_0 = arith.constant 0 : index
    %0 = vector.load %arg1[%c0, %c0_0] : memref<16x32xf32, #tpu.memory_space<vmem>>, vector<16x32xf32>
    %1 = arith.truncf %0 : vector<16x32xf32> to vector<16x32xbf16>
    %c0_1 = arith.constant 0 : index
    %c0_2 = arith.constant 0 : index
    %2 = vector.load %arg2[%c0_1, %c0_2] : memref<32x32xf32, #tpu.memory_space<vmem>>, vector<32x32xf32>
    %3 = arith.truncf %2 : vector<32x32xf32> to vector<32x32xbf16>
    %c0_3 = arith.constant 0 : index
    %c0_4 = arith.constant 0 : index
    %4 = vector.load %arg3[%c0_3, %c0_4] : memref<32x32xf32, #tpu.memory_space<vmem>>, vector<32x32xf32>
    %5 = arith.truncf %4 : vector<32x32xf32> to vector<32x32xbf16>
    %c0_5 = arith.constant 0 : index
    %c0_6 = arith.constant 0 : index
    %6 = vector.load %arg4[%c0_5, %c0_6] : memref<32x32xf32, #tpu.memory_space<vmem>>, vector<32x32xf32>
    %7 = arith.truncf %6 : vector<32x32xf32> to vector<32x32xbf16>
    %cst = arith.constant dense<0.000000e+00> : vector<16x32xf32>
    %8 = tpu.matmul %1, %3, %cst {dimension_numbers = #tpu.dot_dimension_numbers<[1], [0], [0], [1], [0, 0, 1, 1], [], []>} : vector<16x32xbf16>, vector<32x32xbf16>, vector<16x32xf32> -> vector<16x32xf32>
    %c0_7 = arith.constant 0 : index
    %c0_8 = arith.constant 0 : index
    %9 = vector.load %arg5[%c0_7, %c0_8] : memref<1x32xf32, #tpu.memory_space<vmem>>, vector<1x32xf32>
    %10 = vector.broadcast %9 : vector<1x32xf32> to vector<16x32xf32>
    %11 = arith.addf %8, %10 : vector<16x32xf32>
    %cst_9 = arith.constant 0.176776692 : f32
    %12 = vector.broadcast %cst_9 : f32 to vector<16x32xf32>
    %13 = arith.mulf %11, %12 : vector<16x32xf32>
    %14 = arith.truncf %13 : vector<16x32xf32> to vector<16x32xbf16>
    %cst_10 = arith.constant dense<0.000000e+00> : vector<16x32xf32>
    %15 = tpu.matmul %1, %5, %cst_10 {dimension_numbers = #tpu.dot_dimension_numbers<[1], [0], [0], [1], [0, 0, 1, 1], [], []>} : vector<16x32xbf16>, vector<32x32xbf16>, vector<16x32xf32> -> vector<16x32xf32>
    %c0_11 = arith.constant 0 : index
    %c0_12 = arith.constant 0 : index
    %16 = vector.load %arg6[%c0_11, %c0_12] : memref<1x32xf32, #tpu.memory_space<vmem>>, vector<1x32xf32>
    %17 = vector.broadcast %16 : vector<1x32xf32> to vector<16x32xf32>
    %18 = arith.addf %15, %17 : vector<16x32xf32>
    %19 = arith.truncf %18 : vector<16x32xf32> to vector<16x32xbf16>
    %cst_13 = arith.constant dense<0.000000e+00> : vector<16x32xf32>
    %20 = tpu.matmul %1, %7, %cst_13 {dimension_numbers = #tpu.dot_dimension_numbers<[1], [0], [0], [1], [0, 0, 1, 1], [], []>} : vector<16x32xbf16>, vector<32x32xbf16>, vector<16x32xf32> -> vector<16x32xf32>
    %c0_14 = arith.constant 0 : index
    %c0_15 = arith.constant 0 : index
    %21 = vector.load %arg7[%c0_14, %c0_15] : memref<1x32xf32, #tpu.memory_space<vmem>>, vector<1x32xf32>
    %22 = vector.broadcast %21 : vector<1x32xf32> to vector<16x32xf32>
    %23 = arith.addf %20, %22 : vector<16x32xf32>
    %24 = arith.truncf %23 : vector<16x32xf32> to vector<16x32xbf16>
    %25 = vector.extract_strided_slice %14 {offsets = [0, 0], sizes = [8, 32], strides = [1, 1]} : vector<16x32xbf16> to vector<8x32xbf16>
    %26 = vector.extract_strided_slice %19 {offsets = [0, 0], sizes = [8, 32], strides = [1, 1]} : vector<16x32xbf16> to vector<8x32xbf16>
    %27 = vector.extract_strided_slice %24 {offsets = [0, 0], sizes = [8, 32], strides = [1, 1]} : vector<16x32xbf16> to vector<8x32xbf16>
    %cst_16 = arith.constant dense<0.000000e+00> : vector<8x8xf32>
    %28 = tpu.matmul %25, %26, %cst_16 {dimension_numbers = #tpu.dot_dimension_numbers<[1], [1], [0], [0], [0, 0, 1, 0], [], []>} : vector<8x32xbf16>, vector<8x32xbf16>, vector<8x8xf32> -> vector<8x8xf32>
    %cst_17 = arith.constant dense<0xFF800000> : vector<8xf32>
    %29 = vector.multi_reduction <maximumf>, %28, %cst_17 [1] : vector<8x8xf32> to vector<8xf32>
    %30 = vector.shape_cast %29 : vector<8xf32> to vector<8x1xf32>
    %31 = vector.broadcast %30 : vector<8x1xf32> to vector<8x8xf32>
    %32 = arith.subf %28, %31 : vector<8x8xf32>
    %33 = math.exp %32 : vector<8x8xf32>
    %cst_18 = arith.constant dense<0.000000e+00> : vector<8xf32>
    %34 = vector.multi_reduction <add>, %33, %cst_18 [1] : vector<8x8xf32> to vector<8xf32>
    %35 = vector.shape_cast %34 : vector<8xf32> to vector<8x1xf32>
    %36 = tpu.reciprocal %35 {approx = true} : vector<8x1xf32> -> vector<8x1xf32>
    %37 = vector.broadcast %36 : vector<8x1xf32> to vector<8x8xf32>
    %38 = arith.mulf %33, %37 : vector<8x8xf32>
    %39 = arith.truncf %38 : vector<8x8xf32> to vector<8x8xbf16>
    %cst_19 = arith.constant dense<0.000000e+00> : vector<8x32xf32>
    %40 = tpu.matmul %39, %27, %cst_19 {dimension_numbers = #tpu.dot_dimension_numbers<[1], [0], [0], [1], [0, 0, 1, 1], [], []>} : vector<8x8xbf16>, vector<8x32xbf16>, vector<8x32xf32> -> vector<8x32xf32>
    %c0_20 = arith.constant 0 : index
    %c0_21 = arith.constant 0 : index
    %41 = vector.load %arg8[%c0_20, %c0_21] : memref<16x32xf32, #tpu.memory_space<vmem>>, vector<8x32xf32>
    tpu.vector_store %arg8[%c0_20, %c0_21], %40 {strides = array<i32>} : memref<16x32xf32, #tpu.memory_space<vmem>>, vector<8x32xf32>,
    %42 = vector.extract_strided_slice %14 {offsets = [8, 0], sizes = [8, 32], strides = [1, 1]} : vector<16x32xbf16> to vector<8x32xbf16>
    %43 = vector.extract_strided_slice %19 {offsets = [8, 0], sizes = [8, 32], strides = [1, 1]} : vector<16x32xbf16> to vector<8x32xbf16>
    %44 = vector.extract_strided_slice %24 {offsets = [8, 0], sizes = [8, 32], strides = [1, 1]} : vector<16x32xbf16> to vector<8x32xbf16>
    %cst_22 = arith.constant dense<0.000000e+00> : vector<8x8xf32>
    %45 = tpu.matmul %42, %43, %cst_22 {dimension_numbers = #tpu.dot_dimension_numbers<[1], [1], [0], [0], [0, 0, 1, 0], [], []>} : vector<8x32xbf16>, vector<8x32xbf16>, vector<8x8xf32> -> vector<8x8xf32>
    %cst_23 = arith.constant dense<0xFF800000> : vector<8xf32>
    %46 = vector.multi_reduction <maximumf>, %45, %cst_23 [1] : vector<8x8xf32> to vector<8xf32>
    %47 = vector.shape_cast %46 : vector<8xf32> to vector<8x1xf32>
    %48 = vector.broadcast %47 : vector<8x1xf32> to vector<8x8xf32>
    %49 = arith.subf %45, %48 : vector<8x8xf32>
    %50 = math.exp %49 : vector<8x8xf32>
    %cst_24 = arith.constant dense<0.000000e+00> : vector<8xf32>
    %51 = vector.multi_reduction <add>, %50, %cst_24 [1] : vector<8x8xf32> to vector<8xf32>
    %52 = vector.shape_cast %51 : vector<8xf32> to vector<8x1xf32>
    %53 = tpu.reciprocal %52 {approx = true} : vector<8x1xf32> -> vector<8x1xf32>
    %54 = vector.broadcast %53 : vector<8x1xf32> to vector<8x8xf32>
    %55 = arith.mulf %50, %54 : vector<8x8xf32>
    %56 = arith.truncf %55 : vector<8x8xf32> to vector<8x8xbf16>
    %cst_25 = arith.constant dense<0.000000e+00> : vector<8x32xf32>
    %57 = tpu.matmul %56, %44, %cst_25 {dimension_numbers = #tpu.dot_dimension_numbers<[1], [0], [0], [1], [0, 0, 1, 1], [], []>} : vector<8x8xbf16>, vector<8x32xbf16>, vector<8x32xf32> -> vector<8x32xf32>
    %c8 = arith.constant 8 : index
    %c0_26 = arith.constant 0 : index
    %58 = vector.load %arg8[%c8, %c0_26] : memref<16x32xf32, #tpu.memory_space<vmem>>, vector<8x32xf32>
    tpu.vector_store %arg8[%c8, %c0_26], %57 {strides = array<i32>} : memref<16x32xf32, #tpu.memory_space<vmem>>, vector<8x32xf32>,
    return
  }
  func.func @transform_0(%arg0: i32) -> (i32, i32) {
    %c0_i32 = arith.constant 0 : i32
    %c0_i32_0 = arith.constant 0 : i32
    return %arg0, %c0_i32 : i32, i32
  }
  func.func @transform_1(%arg0: i32) -> (i32, i32) {
    %c0_i32 = arith.constant 0 : i32
    %c0_i32_0 = arith.constant 0 : i32
    %c0_i32_1 = arith.constant 0 : i32
    return %c0_i32, %c0_i32_0 : i32, i32
  }
  func.func @transform_2(%arg0: i32) -> (i32, i32) {
    %c0_i32 = arith.constant 0 : i32
    %c0_i32_0 = arith.constant 0 : i32
    %c0_i32_1 = arith.constant 0 : i32
    return %c0_i32, %c0_i32_0 : i32, i32
  }
  func.func @transform_3(%arg0: i32) -> (i32, i32) {
    %c0_i32 = arith.constant 0 : i32
    %c0_i32_0 = arith.constant 0 : i32
    %c0_i32_1 = arith.constant 0 : i32
    return %c0_i32, %c0_i32_0 : i32, i32
  }
  func.func @transform_4(%arg0: i32) -> (i32, i32) {
    %c0_i32 = arith.constant 0 : i32
    %c0_i32_0 = arith.constant 0 : i32
    %c0_i32_1 = arith.constant 0 : i32
    return %c0_i32, %c0_i32_0 : i32, i32
  }
  func.func @transform_5(%arg0: i32) -> (i32, i32) {
    %c0_i32 = arith.constant 0 : i32
    %c0_i32_0 = arith.constant 0 : i32
    %c0_i32_1 = arith.constant 0 : i32
    return %c0_i32, %c0_i32_0 : i32, i32
  }
  func.func @transform_6(%arg0: i32) -> (i32, i32) {
    %c0_i32 = arith.constant 0 : i32
    %c0_i32_0 = arith.constant 0 : i32
    %c0_i32_1 = arith.constant 0 : i32
    return %c0_i32, %c0_i32_0 : i32, i32
  }
  func.func @transform_7(%arg0: i32) -> (i32, i32) {
    %c0_i32 = arith.constant 0 : i32
    %c0_i32_0 = arith.constant 0 : i32
    return %arg0, %c0_i32 : i32, i32
  }
}

</mosaic_0001>

<bundles_post_ra>
// kernel: self_attention.1
= control target key start
LH: loop header
LB: loop body
LE: loop exit
PB: predicated region body
PF: predicated region fallthrough
CT: control target
= control target key end

     0   :  { %12 = vsyncpa [#allocation3], 0  ;;  %s890_s0 = inlined_call_operand.hbm [shape: f32[16,32], index: 0, kind: input, shape index: {}]   ;;  %s891_s1 = inlined_call_operand.hbm [shape: f32[32,32], index: 1, kind: input, shape index: {}]   ;;  %s892_s2 = inlined_call_operand.hbm [shape: f32[32,32], index: 2, kind: input, shape index: {}]   ;;  %s893_s3 = inlined_call_operand.hbm [shape: f32[32,32], index: 3, kind: input, shape index: {}]   ;;  %s894_s4 = inlined_call_operand.vmem [shape: f32[1,32], index: 4, kind: input, shape index: {}]   ;;  %s895_s5 = inlined_call_operand.vmem [shape: f32[1,32], index: 5, kind: input, shape index: {}]   ;;  %s896_s6 = inlined_call_operand.vmem [shape: f32[1,32], index: 6, kind: input, shape index: {}]   ;;  %s897_s7 = inlined_call_operand.hbm [shape: f32[16,32], index: 7, kind: output, shape index: {}]  }
   0x1   :  { %13 = vsyncpa [#allocation6], 0 }
   0x2   :  { %14 = vsyncpa [#allocation9], 0 }
   0x3   :  { %15 = vsyncpa [#allocation4], 0  ;;  %s704_s24 = smov [#allocation5]   ;;  %s705_s26 = smov [#allocation2]  }
   0x4   :  { %s33_s25 = sshll.u32 %s704_s24, 4  ;;  %s21_s27 = sshll.u32 %s705_s26, 4  ;;  %s34_s25 = int_to_ptr.vmem [resolvable:$true] %s33_s25  ;;  %s753_s27 = int_to_ptr.vmem [resolvable:$true] %s21_s27 }
   0x5   :  { %s586_s30 = scalar_lea.hbm %s891_s1, 512 }
   0x6   :  { %p587_p0 = scmp.ne.s32.totalorder %s891_s1, %s586_s30  ;;  %p590_p1 = scmp.lt.u32.totalorder %s586_s30, %s891_s1 }
   0x8   :  { %p592_p2 = pnand %p590_p1, %p587_p0 }
   0xa   :  { %595 = shalt.err (!%p592_p2)
}
   0xb   :  { %s596_s12 = scalar_lea.vmem %s34_s25, 512  ;;  %p601_p4 = scmp.lt.s32.totalorder %s34_s25, %s34_s25 }
   0xc   :  { %p597_p3 = scmp.ne.s32.totalorder %s34_s25, %s596_s12  ;;  %p602_p5 = scmp.lt.s32.totalorder %s596_s12, %s596_s12 }
   0xe   :  { %p603_p6 = por %p602_p5, %p601_p4 }
  0x10   :  { %p604_p7 = pnand %p603_p6, %p597_p3 }
  0x12   :  { %607 = shalt.err (!%p604_p7)
}
  0x13   :  { %s706_s13 = smov 128   ;;  %s707_s14 = smov 8  }
  0x14   :  { %39 = dma.hbm_to_vmem [thread:$0]  %s891_s1, 512, %s34_s25, [#allocation6], %s706_s13, %s706_s13, %s707_s14  }
  0x15   :  { %s608_s19 = scalar_lea.hbm %s890_s0, 256 }
  0x16   :  { %p609_p8 = scmp.ne.s32.totalorder %s890_s0, %s608_s19  ;;  %p612_p9 = scmp.lt.u32.totalorder %s608_s19, %s890_s0 }
  0x18   :  { %p614_p10 = pnand %p612_p9, %p609_p8 }
  0x1a   :  { %617 = shalt.err (!%p614_p10)
}
  0x1b   :  { %s618_s24 = scalar_lea.vmem %s753_s27, 256  ;;  %p623_p12 = scmp.lt.s32.totalorder %s753_s27, %s753_s27 }
  0x1c   :  { %p619_p11 = scmp.ne.s32.totalorder %s753_s27, %s618_s24  ;;  %p624_p13 = scmp.lt.s32.totalorder %s618_s24, %s618_s24 }
  0x1e   :  { %p625_p0 = por %p624_p13, %p623_p12 }
  0x20   :  { %p626_p1 = pnand %p625_p0, %p619_p11 }
  0x22   :  { %629 = shalt.err (!%p626_p1)
}
  0x23   :  { %27 = dma.hbm_to_vmem [thread:$0]  %s890_s0, 256, %s753_s27, [#allocation3], %s706_s13, %s706_s13, %s707_s14  }
  0x24   :  { %s708_s26 = smov [#allocation7]   ;;  %s709_s29 = smov [#allocation8]  }
  0x25   :  { %s45_s28 = sshll.u32 %s708_s26, 4  ;;  %s57_s30 = sshll.u32 %s709_s29, 4  ;;  %s46_s28 = int_to_ptr.vmem [resolvable:$true] %s45_s28  ;;  %s790_s30 = int_to_ptr.vmem [resolvable:$true] %s57_s30 }
  0x26   :  { %s630_s10 = scalar_lea.hbm %s892_s2, 512 }
  0x27   :  { %p631_p2 = scmp.ne.s32.totalorder %s892_s2, %s630_s10  ;;  %p634_p3 = scmp.lt.u32.totalorder %s630_s10, %s892_s2 }
  0x29   :  { %p636_p4 = pnand %p634_p3, %p631_p2 }
  0x2b   :  { %639 = shalt.err (!%p636_p4)
}
  0x2c   :  { %s640_s0 = scalar_lea.vmem %s46_s28, 512  ;;  %p645_p6 = scmp.lt.s32.totalorder %s46_s28, %s46_s28 }
  0x2d   :  { %p641_p5 = scmp.ne.s32.totalorder %s46_s28, %s640_s0  ;;  %p646_p7 = scmp.lt.s32.totalorder %s640_s0, %s640_s0 }
  0x2f   :  { %p647_p8 = por %p646_p7, %p645_p6 }
  0x31   :  { %p648_p9 = pnand %p647_p8, %p641_p5 }
  0x33   :  { %651 = shalt.err (!%p648_p9)
}
  0x34   :  { %51 = dma.hbm_to_vmem [thread:$0]  %s892_s2, 512, %s46_s28, [#allocation6], %s706_s13, %s706_s13, %s707_s14  }
  0x35   :  { %s652_s20 = scalar_lea.hbm %s893_s3, 512 }
  0x36   :  { %p653_p10 = scmp.ne.s32.totalorder %s893_s3, %s652_s20  ;;  %p656_p11 = scmp.lt.u32.totalorder %s652_s20, %s893_s3 }
  0x38   :  { %p658_p12 = pnand %p656_p11, %p653_p10 }
  0x3a   :  { %661 = shalt.err (!%p658_p12)
}
  0x3b   :  { %s662_s1 = scalar_lea.vmem %s790_s30, 512  ;;  %p667_p0 = scmp.lt.s32.totalorder %s790_s30, %s790_s30 }
  0x3c   :  { %p663_p13 = scmp.ne.s32.totalorder %s790_s30, %s662_s1  ;;  %p668_p1 = scmp.lt.s32.totalorder %s662_s1, %s662_s1 }
  0x3e   :  { %p669_p2 = por %p668_p1, %p667_p0 }
  0x40   :  { %p670_p3 = pnand %p669_p2, %p663_p13 }
  0x42   :  { %673 = shalt.err (!%p670_p3)
}
  0x43   :  { %63 = dma.hbm_to_vmem [thread:$0]  %s893_s3, 512, %s790_s30, [#allocation9], %s706_s13, %s706_s13, %s707_s14  }
  0x44   :  { %696 = dma.done.wait [#allocation3], 256  }
  0x45   :  { %697 = vsyncadd [#allocation3], 4294967040 }
  0x46   :  { %698 = dma.done.wait [#allocation6], 1024  }
  0x47   :  { %699 = vsyncadd [#allocation6], 4294966272 }
  0x48   :  { %700 = dma.done.wait [#allocation9], 512  }
  0x49   :  { %701 = vsyncadd [#allocation9], 4294966784  ;;  %v710_v0 = vmov 0.0   ;;  %vm711_vm0 = vmmov 0   ;;  %v92_v1 = vld [vmem:[#allocation7] sm:$0xff]  ;;  %v93_v2 = vld [vmem:[#allocation7 + $0x8] sm:$0xff] }
  0x4a   :  { %529 = vmatprep.subr.bf16.mxu1 %v710_v0  ;;  %521 = vmatprep.subr.bf16.mxu0 %v710_v0  ;;  %v86_v3 = vld [vmem:[#allocation5] sm:$0xff]  ;;  %v96_v4 = vpack.c.bf16 %v93_v2, %v92_v1  ;;  %v87_v5 = vld [vmem:[#allocation5 + $0x8] sm:$0xff]  ;;  %v94_v6 = vld [vmem:[#allocation7 + $0x10] sm:$0xff]  ;;  %vm111_vm1 = vcmask 261120   ;;  %vm303_vm2 = vcmask 64512   ;;  %vm319_vm3 = vcmask 1043456  }
  0x4b   :  { %533 = vmatprep.mubr.msk.bf16.mxu1 %vm711_vm0, %v710_v0  ;;  %525 = vmatprep.mubr.msk.bf16.mxu0 %vm711_vm0, %v710_v0  ;;  %v95_v7 = vld [vmem:[#allocation7 + $0x18] sm:$0xff]  ;;  %v90_v8 = vpack.c.bf16 %v87_v5, %v86_v3  ;;  %v88_v9 = vld [vmem:[#allocation5 + $0x10] sm:$0xff]  ;;  %v98_v38 = vld [vmem:[#allocation8] sm:$0xff] }
  0x4c   :  { %530 = vmatpush3.bf16.msra.mxu1 %v96_v4  ;;  %v97_v10 = vpack.c.bf16 %v95_v7, %v94_v6  ;;  %v83_v11 = vld [vmem:[#allocation2] sm:$0xff]  ;;  %v84_v12 = vld [vmem:[#allocation2 + $0x8] sm:$0xff]  ;;  %v99_v39 = vld [vmem:[#allocation8 + $0x8] sm:$0xff] }
  0x4d   :  { %v89_v13 = vld [vmem:[#allocation5 + $0x18] sm:$0xff]  ;;  %531 = vmatprep.subr.bf16.mxu1 %v710_v0  ;;  %522 = vmatpush3.bf16.msra.mxu0 %v90_v8  ;;  %v85_v15 = vpack.c.bf16 %v84_v12, %v83_v11  ;;  %v494_v16 = vld [vmem:[%s894_s4] ss:$0 sm:$0xff]  ;;  %v102_v41 = vpack.c.bf16 %v99_v39, %v98_v38 }
  0x4e   :  { %v91_v14 = vpack.c.bf16 %v89_v13, %v88_v9  ;;  %523 = vmatprep.subr.bf16.mxu0 %v710_v0  ;;  %v496_v17 = vld [vmem:[%s895_s5] ss:$0 sm:$0xff]  ;;  %v101_v42 = vld [vmem:[#allocation8 + $0x18] sm:$0xff] }
  0x4f   :  { %v100_v40 = vld [vmem:[#allocation8 + $0x10] sm:$0xff] }
  0x50   :  { %532 = vmatpush3.bf16.msra.mxu1 %v97_v10  ;;  %v103_v43 = vpack.c.bf16 %v101_v42, %v100_v40  ;;  %v498_v3 = vld [vmem:[%s896_s6] ss:$0 sm:$0xff]  ;;  %s712_s6 = smov [#allocation10]  }
  0x51   :  { %524 = vmatpush3.bf16.msra.mxu0 %v91_v14  ;;  %545 = vmatprep.subr.bf16.mxu1 %v710_v0  ;;  %s480_s30 = sshll.u32 %s712_s6, 4  ;;  %s481_s30 = int_to_ptr.vmem [resolvable:$true] %s480_s30 }
  0x52   :  { %537 = vmatprep.subr.bf16.mxu0 %v710_v0  ;;  %s674_s8 = scalar_lea.vmem %s481_s30, 256  ;;  %p679_p5 = scmp.lt.s32.totalorder %s481_s30, %s481_s30 }
  0x53   :  { %534 = vmatmul.mubr.msk.bf16.vlgmr.msra.gmra.mrb[0].mxu1 %vm111_vm1, %v85_v15  ;;  %p675_p4 = scmp.ne.s32.totalorder %s481_s30, %s674_s8  ;;  %p680_p6 = scmp.lt.s32.totalorder %s674_s8, %s674_s8 }
  0x54   :  { %526 = vmatmul.mubr.msk.bf16.vlgmr.msra.gmra.mrb[0].mxu0 %vm111_vm1, %v85_v15  ;;  %547 = vmatprep.mubr.msk.bf16.mxu1 %vm711_vm0, %v710_v0 }
  0x55   :  { %541 = vmatprep.mubr.msk.bf16.mxu0 %vm711_vm0, %v710_v0  ;;  %538 = vmatpush3.bf16.msra.mxu0 %v102_v41  ;;  %p681_p7 = por %p680_p6, %p679_p5 }
  0x56   :  { %539 = vmatprep.subr.bf16.mxu0 %v710_v0 }
  0x57   :  { %p682_p8 = pnand %p681_p7, %p675_p4 }
  0x59   :  { %540 = vmatpush3.bf16.msra.mxu0 %v103_v43 }
  0x5a   :  { %551 = vmatprep.subr.bf16.mxu0 %v710_v0 }
  0x5c   :  { %542 = vmatmul.mubr.msk.bf16.vlgmr.msra.gmra.mrb[4].mxu0 %vm111_vm1, %v85_v15 }
  0x5d   :  { %553 = vmatprep.mubr.msk.bf16.mxu0 %vm711_vm0, %v710_v0 }
 0x126   :  { %v200_v18 = vpop.f32.mrb[0].mxu1 }
 0x127   :  { %v535_v19 = vpop.f32.mrb[1].mxu1  ;;  %v149_v20 = vpop.f32.mrb[0].mxu0  ;;  %v201_v24 = vadd.f32 %v496_v17, %v200_v18 }
 0x128   :  { %v203_v21 = vpop.f32.mrb[2].mxu1  ;;  %v150_v22 = vadd.f32 %v494_v16, %v149_v20  ;;  %v527_v23 = vpop.f32.mrb[1].mxu0 }
 0x129   :  { %v204_v25 = vadd.f32 %v496_v17, %v203_v21  ;;  %v536_v26 = vpop.f32.mrb[3].mxu1  ;;  %v152_v27 = vpop.f32.mrb[2].mxu0 }
 0x12a   :  { %v156_v28 = vmul.f32 0.17677669, %v150_v22  ;;  %v153_v29 = vadd.f32 %v494_v16, %v152_v27  ;;  %v528_v30 = vpop.f32.mrb[3].mxu0 }
 0x12b   :  { %v207_v31 = vpack.c.bf16 %v204_v25, %v201_v24 }
 0x12c   :  { %v157_v32 = vmul.f32 0.17677669, %v153_v29 }
 0x12d   :  { %v261_v33 = vsel %vm111_vm1, %v207_v31, 0  ;;  %v367_v35 = vrot.slane %v207_v31, 4 }
 0x12e   :  { %v158_v34 = vpack.c.bf16 %v157_v32, %v156_v28  ;;  %546 = vmatpush3.bf16.xpose.msra.mxu1 %v261_v33 }
 0x12f   :  { %557 = vmatprep.subr.bf16.mxu1 %v710_v0  ;;  %v372_v36 = vsel %vm111_vm1, %v367_v35, 0  ;;  %v249_v54 = vpop.f32.mrb[4].mxu0 }
 0x130   :  { %v365_v37 = vrot.slane %v158_v34, 4  ;;  %v543_v55 = vpop.f32.mrb[5].mxu0  ;;  %v250_v4 = vadd.f32 %v498_v3, %v249_v54 }
 0x131   :  { %v252_v5 = vpop.f32.mrb[6].mxu0 }
 0x132   :  { %v544_v6 = vpop.f32.mrb[7].mxu0  ;;  %v253_v7 = vadd.f32 %v498_v3, %v252_v5 }
 0x134   :  { %v256_v8 = vpack.c.bf16 %v253_v7, %v250_v4 }
 0x135   :  { %548 = vmatmul.mubr.msk.bf16.vlgmr.msra.gmra.mrb[4].mxu1 %vm111_vm1, %v158_v34 }
 0x136   :  { %558 = vmatpush3.bf16.xpose.msra.mxu1 %v372_v36  ;;  %559 = vmatprep.mubr.msk.bf16.mxu1 %vm711_vm0, %v710_v0  ;;  %v427_v9 = vrot.slane %v256_v8, 4  ;;  %v321_v10 = vsel %vm319_vm3, %v256_v8, 0 }
 0x137   :  { %552 = vmatpush3.bf16.msra.mxu0 %v321_v10 }
 0x138   :  { %563 = vmatprep.subr.bf16.mxu0 %v710_v0  ;;  %v432_v11 = vsel %vm319_vm3, %v427_v9, 0 }
 0x13d   :  { %560 = vmatmul.mubr.msk.bf16.vlgmr.msra.gmra.mrb[8].mxu1 %vm111_vm1, %v365_v37 }
 0x208   :  { %v297_v44 = vpop.f32.mrb[4].mxu1 }
 0x209   :  { %v549_v45 = vpop.f32.mrb[5].mxu1  ;;  %v304_v46 = vsel %vm303_vm2, %v297_v44, -inf }
 0x20a   :  { %305 = vmax.xlane.f32.xlu0 %v304_v46  ;;  %v300_v47 = vpop.f32.mrb[6].mxu1 }
 0x20b   :  { %v550_v48 = vpop.f32.mrb[7].mxu1 }
 0x210   :  { %v408_v49 = vpop.f32.mrb[8].mxu1 }
 0x211   :  { %v561_v50 = vpop.f32.mrb[9].mxu1  ;;  %v414_v51 = vsel %vm303_vm2, %v408_v49, -inf }
 0x212   :  { %415 = vmax.xlane.f32.xlu0 %v414_v51  ;;  %v411_v52 = vpop.f32.mrb[10].mxu1 }
 0x213   :  { %v562_v53 = vpop.f32.mrb[11].mxu1 }
 0x297   :  { %v306_v56 = vpop.xlane.xlu0 %305 }
 0x298   :  { %v307_v57 = vsub.f32 %v297_v44, %v306_v56 }
 0x29a   :  { %v308_v58 = vmul.f32 1.442695, %v307_v57 }
 0x29c   :  { %578 = vpow2.f32 %v308_v58 }
 0x29f   :  { %v416_v59 = vpop.xlane.xlu0 %415 }
 0x2a0   :  { %v417_v60 = vsub.f32 %v408_v49, %v416_v59 }
 0x2a2   :  { %v418_v61 = vmul.f32 1.442695, %v417_v60 }
 0x2a4   :  { %580 = vpow2.f32 %v418_v61 }
 0x2a6   :  { %v579_v62 = vpop.eup %578 }
 0x2a7   :  { %v310_v63 = vsel %vm303_vm2, %v579_v62, 0.0 }
 0x2a8   :  { %311 = vadd.xlane.f32.xlu1 %v310_v63 }
 0x2ae   :  { %v581_v1 = vpop.eup %580 }
 0x2af   :  { %v420_v2 = vsel %vm303_vm2, %v581_v1, 0.0 }
 0x2b0   :  { %421 = vadd.xlane.f32.xlu1 %v420_v2 }
 0x335   :  { %v312_v12 = vpop.xlane.xlu1 %311 }
 0x336   :  { %582 = vrcp.f32 %v312_v12 }
 0x33d   :  { %v422_v13 = vpop.xlane.xlu1 %421 }
 0x33e   :  { %584 = vrcp.f32 %v422_v13 }
 0x340   :  { %v583_v14 = vpop.eup %582 }
 0x341   :  { %v314_v15 = vmul.f32 %v583_v14, %v579_v62 }
 0x343   :  { %v315_v16 = vpack.c.bf16 %v314_v15, %v314_v15 }
 0x345   :  { %554 = vmatmul.mubr.msk.bf16.vlgmr.msra.gmra.mrb[8].mxu0 %vm303_vm2, %v315_v16 }
 0x346   :  { %564 = vmatpush3.bf16.msra.mxu0 %v432_v11  ;;  %565 = vmatprep.mubr.msk.bf16.mxu0 %vm711_vm0, %v710_v0 }
 0x348   :  { %v585_v17 = vpop.eup %584 }
 0x349   :  { %v424_v18 = vmul.f32 %v585_v17, %v581_v1 }
 0x34b   :  { %v425_v19 = vpack.c.bf16 %v424_v18, %v424_v18 }
 0x34d   :  { %566 = vmatmul.mubr.msk.bf16.vlgmr.msra.gmra.mrb[12].mxu0 %vm303_vm2, %v425_v19 }
 0x418   :  { %v357_v20 = vpop.f32.mrb[8].mxu0 }
 0x419   :  { %363 = vst.msk [vmem:[#allocation10] sm:$0xff] %vm111_vm1, %v357_v20  ;;  %v555_v21 = vpop.f32.mrb[9].mxu0 }
 0x41a   :  { %v360_v22 = vpop.f32.mrb[10].mxu0 }
 0x41b   :  { %v556_v23 = vpop.f32.mrb[11].mxu0 }
 0x420   :  { %v468_v24 = vpop.f32.mrb[12].mxu0 }
 0x421   :  { %474 = vst.msk [vmem:[#allocation10 + $0x8] sm:$0xff] %vm111_vm1, %v468_v24  ;;  %v567_v25 = vpop.f32.mrb[13].mxu0 }
 0x422   :  { %v471_v26 = vpop.f32.mrb[14].mxu0 }
 0x423   :  { %685 = shalt.err (!%p682_p8)
}
 0x424   :  { %s686_s11 = scalar_lea.hbm %s897_s7, 256 }
 0x425   :  { %p687_p9 = scmp.ne.s32.totalorder %s897_s7, %s686_s11  ;;  %p690_p10 = scmp.lt.u32.totalorder %s686_s11, %s897_s7 }
 0x427   :  { %p692_p11 = pnand %p690_p10, %p687_p9 }
 0x429   :  { %695 = shalt.err (!%p692_p11)
}
 0x42a   :  { %486 = dma.vmem_to_hbm [thread:$0]  %s481_s30, 256, %s897_s7, [#allocation4], %s706_s13, %s706_s13, %s707_s14   ;;  %v568_v0 = vpop.f32.mrb[15].mxu0 }
 0x42b   :  { %702 = dma.done.wait [#allocation4], 256  }
 0x42c   :  { %703 = vsyncadd [#allocation4], 4294967040 }
 0x42d   :  { %490 = vsyncpa [#allocation3], 1 }
 0x42e   :  { %491 = vsyncpa [#allocation6], 1 }
 0x42f   :  { %492 = vsyncpa [#allocation9], 1 }
 0x430   :  { %493 = vsyncpa [#allocation4], 1 }

</bundles_post_ra>
